<compile_context>
chip_gen: v7x
topology: tpu7x:2x2x1
jax: 0.10.0
libtpu: 0.0.40
codegen_flags: <defaults>
</compile_context>

<pallas_src>
import functools
import math

import jax
import jax.numpy as jnp
import numpy as np
from jax.experimental import pallas as pl
from jax.experimental.pallas import tpu as pltpu

HIDDEN = 64          # hidden_channels
HEAD_DIM = 16
NUM_HEADS = HIDDEN // HEAD_DIM
BATCH = 2
SEQ = 8
LN_EPS = 1e-5        # nn.LayerNorm default
D_TILDE = 1


def _heads_to_front(x3):
    """(m, h, d) -> (h, m, d): make heads the leading batch dim for the batched MXU matmuls."""
    if hasattr(pltpu, "einshape"):
        return pltpu.einshape("mhd->hmd", x3)
    return jnp.swapaxes(x3, 0, 1)


def _heads_to_back(x3):
    """(h, m, d) -> (m, h, d)."""
    if hasattr(pltpu, "einshape"):
        return pltpu.einshape("hmd->mhd", x3)
    return jnp.swapaxes(x3, 0, 1)


def _isa_kernel(x_ref, wq_ref, wk_ref, wv_ref, wo_ref, gamma_ref, beta_ref,
                bias_ref, out_ref, *, bb, L, H, nh, d):
    """One batch-block per grid step: QKV proj -> MHA (heads batched) -> LayerNorm -> out_proj."""
    n = bb * L
    x2 = x_ref[...].reshape(n, H)                                    # (bb*L, H)

    # Projections (no bias; use_linear_bias=False).  Query scaling is pre-folded into Wq.
    q = jnp.dot(x2, wq_ref[...], preferred_element_type=jnp.float32)
    k = jnp.dot(x2, wk_ref[...], preferred_element_type=jnp.float32)
    v = jnp.dot(x2, wv_ref[...], preferred_element_type=jnp.float32)

    # (bb*L, H) -> (nh, bb*L, d): one head-batched matmul instead of a per-head Python loop.
    qh = _heads_to_front(q.reshape(n, nh, d))
    kh = _heads_to_front(k.reshape(n, nh, d))
    vh = _heads_to_front(v.reshape(n, nh, d))

    # One batched score matmul for every head (and every packed batch element).
    s = jnp.einsum("hqd,hkd->hqk", qh, kh, preferred_element_type=jnp.float32)
    # attn_bias + key-padding(-inf) + cross-batch(-inf), pre-folded host-side: a single add.
    s = s + bias_ref[...]

    # Single float32 softmax (matches F.softmax(..., dtype=torch.float32)).
    s = s - jnp.max(s, axis=-1, keepdims=True)
    p = jnp.exp(s)
    p = p / jnp.sum(p, axis=-1, keepdims=True)
    # dropout is a no-op here (dropout=0.0 / eval mode)

    attn = jnp.einsum("hqk,hkd->hqd", p, vh, preferred_element_type=jnp.float32)
    attn = _heads_to_back(attn).reshape(n, H)                        # (bb*L, H), no lane concat

    # attn_ln: LayerNorm over the hidden dim (float32).
    mu = jnp.mean(attn, axis=-1, keepdims=True)
    var = jnp.mean(jnp.square(attn - mu), axis=-1, keepdims=True)
    ln = (attn - mu) * jax.lax.rsqrt(var + LN_EPS)
    ln = ln * gamma_ref[...] + beta_ref[...]

    # out_proj (bias=False)
    out_ref[...] = jnp.dot(ln, wo_ref[...],
                           preferred_element_type=jnp.float32).reshape(bb, L, H)


def invariant_self_attention_pallas(x, attn_bias, mask, params, batch_block=None):
    B, L, H = x.shape
    nh, d = NUM_HEADS, HEAD_DIM
    bb = B if batch_block is None else batch_block                   # fold batch by default
    assert B % bb == 0
    n_blocks = B // bb
    scaling = (d / D_TILDE) ** 0.5 / d

    wq_t = (params["wq"] * scaling).T                                # fold q scaling into Wq
    wk_t = params["wk"].T
    wv_t = params["wv"].T
    wo_t = params["wo"].T
    gamma = params["ln_gamma"].reshape(1, H)
    beta = params["ln_beta"].reshape(1, H)

    # Precompute one additive bias per batch block, shape (n_blocks, nh, bb*L, bb*L):
    #   - diagonal (same batch element) sub-blocks: attn_bias + (-inf where the key is padded)
    #   - off-diagonal sub-blocks: -inf so packed batch elements never attend to each other.
    # -inf (not a large finite value) keeps semantics identical to masked_fill(..., -inf),
    # including the NaN rows a fully-padded sequence would produce in PyTorch.
    neg_inf = jnp.float32(-jnp.inf)
    ab = attn_bias.astype(jnp.float32).reshape(n_blocks, bb, nh, L, L)
    ab = jnp.transpose(ab, (0, 2, 1, 3, 4))                          # (n_blocks, nh, bb, L, L)
    same = jnp.arange(bb)[:, None] == jnp.arange(bb)[None, :]        # (bb_i, bb_j)
    bias6 = jnp.where(same[None, None, :, None, :, None],
                      ab[:, :, :, :, None, :], neg_inf)              # (n_blocks, nh, bb, L, bb, L)
    keypad = jnp.where(mask.reshape(n_blocks, bb, L), neg_inf, 0.0)  # (n_blocks, bb_j, L)
    bias6 = bias6 + keypad[:, None, None, None, :, :]
    bias_full = bias6.reshape(n_blocks, nh, bb * L, bb * L)

    kernel = functools.partial(_isa_kernel, bb=bb, L=L, H=H, nh=nh, d=d)

    grid_spec = pltpu.PrefetchScalarGridSpec(
        num_scalar_prefetch=0,
        grid=(n_blocks,),
        in_specs=[
            pl.BlockSpec((bb, L, H), lambda g: (g, 0, 0)),            # x
            pl.BlockSpec((H, H), lambda g: (0, 0)),                   # (scaling * Wq)^T
            pl.BlockSpec((H, H), lambda g: (0, 0)),                   # Wk^T
            pl.BlockSpec((H, H), lambda g: (0, 0)),                   # Wv^T
            pl.BlockSpec((H, H), lambda g: (0, 0)),                   # Wo^T
            pl.BlockSpec((1, H), lambda g: (0, 0)),                   # LN gamma
            pl.BlockSpec((1, H), lambda g: (0, 0)),                   # LN beta
            pl.BlockSpec((None, nh, bb * L, bb * L),                  # folded additive bias
                         lambda g: (g, 0, 0, 0)),                     # (leading dim squeezed)
        ],
        out_specs=pl.BlockSpec((bb, L, H), lambda g: (g, 0, 0)),
    )

    return pl.pallas_call(
        kernel,
        out_shape=jax.ShapeDtypeStruct((B, L, H), jnp.float32),
        grid_spec=grid_spec,
        compiler_params=pltpu.CompilerParams(dimension_semantics=("parallel",)),
    )(x, wq_t, wk_t, wv_t, wo_t, gamma, beta, bias_full)


# ----------------------------- pure-JAX reference ------------------------------------------
def invariant_self_attention_ref(x, attn_bias, mask, params):
    B, L, H = x.shape
    nh, d = NUM_HEADS, HEAD_DIM
    scaling = (d / D_TILDE) ** 0.5 / d
    q = (x @ params["wq"].T) * scaling
    k = x @ params["wk"].T
    v = x @ params["wv"].T
    q = q.reshape(B, L, nh, d).transpose(0, 2, 1, 3)
    k = k.reshape(B, L, nh, d).transpose(0, 2, 1, 3)
    v = v.reshape(B, L, nh, d).transpose(0, 2, 1, 3)
    s = jnp.einsum("bhqd,bhkd->bhqk", q, k) + attn_bias
    s = jnp.where(mask[:, None, None, :], -jnp.inf, s)
    p = jax.nn.softmax(s.astype(jnp.float32), axis=-1)
    attn = jnp.einsum("bhqk,bhkd->bhqd", p, v)
    attn = attn.transpose(0, 2, 1, 3).reshape(B, L, H)
    mu = attn.mean(-1, keepdims=True)
    var = jnp.square(attn - mu).mean(-1, keepdims=True)
    ln = (attn - mu) / jnp.sqrt(var + LN_EPS) * params["ln_gamma"] + params["ln_beta"]
    return ln @ params["wo"].T


# ----------------------------- parameter init (deterministic) -------------------------------
def _xavier_uniform(key, shape, gain=1.0):
    # torch weight shape is (out, in): fan_in = shape[1], fan_out = shape[0]
    bound = gain * math.sqrt(6.0 / (shape[0] + shape[1]))
    return jax.random.uniform(key, shape, jnp.float32, -bound, bound)


if __name__ == "__main__":
    root = jax.random.PRNGKey(0)
    kx, kb, kq, kk, kv, ko = jax.random.split(root, 6)

    x = jax.random.normal(kx, (BATCH, SEQ, HIDDEN), jnp.float32)
    attn_bias = 0.1 * jax.random.normal(kb, (BATCH, NUM_HEADS, SEQ, SEQ), jnp.float32)
    # key padding mask: True = padded key (last two keys of batch 1 are padded)
    mask = jnp.zeros((BATCH, SEQ), dtype=bool).at[1, -2:].set(True)

    params = {
        "wq": _xavier_uniform(kq, (HIDDEN, HIDDEN)),
        "wk": _xavier_uniform(kk, (HIDDEN, HIDDEN)),
        "wv": _xavier_uniform(kv, (HIDDEN, HIDDEN)),
        "wo": _xavier_uniform(ko, (HIDDEN, HIDDEN)),
        "ln_gamma": jnp.ones((HIDDEN,), jnp.float32),
        "ln_beta": jnp.zeros((HIDDEN,), jnp.float32),
    }

    ref = jax.block_until_ready(invariant_self_attention_ref(x, attn_bias, mask, params))

    # Default: batch folded into one grid step (best for single-TC v5e/v6e at these shapes).
    out = jax.block_until_ready(invariant_self_attention_pallas(x, attn_bias, mask, params))
    np.testing.assert_allclose(np.asarray(out), np.asarray(ref), rtol=2e-3, atol=2e-3)

    # Parallel-batch-grid variant (what you would use on v7x's 2 TensorCores / larger B).
    out1 = jax.block_until_ready(
        invariant_self_attention_pallas(x, attn_bias, mask, params, batch_block=1))
    np.testing.assert_allclose(np.asarray(out1), np.asarray(ref), rtol=2e-3, atol=2e-3)

    # TODO(synk): dropout (training-mode only), the SFMRotaryEmbedding/RoPE branch
    # (is_protein is not None) and the PBC outcell gather / expand_mask branch are not
    # exercised here; for these inputs (eval, is_protein=None, pbc_expand_batched=None) the
    # PyTorch forward statically skips them too, so semantics match exactly.
    print("KERNEL_OK")
</pallas_src>

<mosaic_0001>
module attributes {stable_mosaic.version = 11 : i64} {
  func.func @_isa_kernel(%arg0: i32, %arg1: memref<2x8x64xf32, #tpu.memory_space<vmem>>, %arg2: memref<64x64xf32, #tpu.memory_space<vmem>>, %arg3: memref<64x64xf32, #tpu.memory_space<vmem>>, %arg4: memref<64x64xf32, #tpu.memory_space<vmem>>, %arg5: memref<64x64xf32, #tpu.memory_space<vmem>>, %arg6: memref<1x64xf32, #tpu.memory_space<vmem>>, %arg7: memref<1x64xf32, #tpu.memory_space<vmem>>, %arg8: memref<1x4x16x16xf32, #tpu.memory_space<vmem>>, %arg9: memref<2x8x64xf32, #tpu.memory_space<vmem>>) attributes {dimension_semantics = [#tpu.dimension_semantics<parallel>], iteration_bounds = array<i64: 1>, scalar_prefetch = 0 : i64, scratch_operands = 0 : i64, tpu.core_type = #tpu.core_type<tc>, window_params = [{transform_indices = @transform_0, window_bounds = array<i64: 2, 8, 64>}, {pipeline_mode = #tpu.pipeline_mode<synchronous>, transform_indices = @transform_1, window_bounds = array<i64: 64, 64>}, {pipeline_mode = #tpu.pipeline_mode<synchronous>, transform_indices = @transform_2, window_bounds = array<i64: 64, 64>}, {pipeline_mode = #tpu.pipeline_mode<synchronous>, transform_indices = @transform_3, window_bounds = array<i64: 64, 64>}, {pipeline_mode = #tpu.pipeline_mode<synchronous>, transform_indices = @transform_4, window_bounds = array<i64: 64, 64>}, {pipeline_mode = #tpu.pipeline_mode<synchronous>, transform_indices = @transform_5, window_bounds = array<i64: 1, 64>}, {pipeline_mode = #tpu.pipeline_mode<synchronous>, transform_indices = @transform_6, window_bounds = array<i64: 1, 64>}, {transform_indices = @transform_7, window_bounds = array<i64: 1, 4, 16, 16>}, {transform_indices = @transform_8, window_bounds = array<i64: 2, 8, 64>}]} {
    %c0 = arith.constant 0 : index
    %c0_0 = arith.constant 0 : index
    %c0_1 = arith.constant 0 : index
    %0 = vector.load %arg1[%c0, %c0_0, %c0_1] : memref<2x8x64xf32, #tpu.memory_space<vmem>>, vector<2x8x64xf32>
    %1 = vector.shape_cast %0 : vector<2x8x64xf32> to vector<16x64xf32>
    %c0_2 = arith.constant 0 : index
    %c0_3 = arith.constant 0 : index
    %2 = vector.load %arg2[%c0_2, %c0_3] : memref<64x64xf32, #tpu.memory_space<vmem>>, vector<64x64xf32>
    %cst = arith.constant dense<0.000000e+00> : vector<16x64xf32>
    %3 = tpu.matmul %1, %2, %cst {dimension_numbers = #tpu.dot_dimension_numbers<[1], [0], [0], [1], [0, 0, 1, 1], [], []>} : vector<16x64xf32>, vector<64x64xf32>, vector<16x64xf32> -> vector<16x64xf32>
    %c0_4 = arith.constant 0 : index
    %c0_5 = arith.constant 0 : index
    %4 = vector.load %arg3[%c0_4, %c0_5] : memref<64x64xf32, #tpu.memory_space<vmem>>, vector<64x64xf32>
    %cst_6 = arith.constant dense<0.000000e+00> : vector<16x64xf32>
    %5 = tpu.matmul %1, %4, %cst_6 {dimension_numbers = #tpu.dot_dimension_numbers<[1], [0], [0], [1], [0, 0, 1, 1], [], []>} : vector<16x64xf32>, vector<64x64xf32>, vector<16x64xf32> -> vector<16x64xf32>
    %c0_7 = arith.constant 0 : index
    %c0_8 = arith.constant 0 : index
    %6 = vector.load %arg4[%c0_7, %c0_8] : memref<64x64xf32, #tpu.memory_space<vmem>>, vector<64x64xf32>
    %cst_9 = arith.constant dense<0.000000e+00> : vector<16x64xf32>
    %7 = tpu.matmul %1, %6, %cst_9 {dimension_numbers = #tpu.dot_dimension_numbers<[1], [0], [0], [1], [0, 0, 1, 1], [], []>} : vector<16x64xf32>, vector<64x64xf32>, vector<16x64xf32> -> vector<16x64xf32>
    %8 = vector.shape_cast %3 : vector<16x64xf32> to vector<16x4x16xf32>
    %9 = tpu.transpose %8, [1, 0, 2] : vector<16x4x16xf32> -> vector<4x16x16xf32>
    %10 = vector.shape_cast %5 : vector<16x64xf32> to vector<16x4x16xf32>
    %11 = tpu.transpose %10, [1, 0, 2] : vector<16x4x16xf32> -> vector<4x16x16xf32>
    %12 = vector.shape_cast %7 : vector<16x64xf32> to vector<16x4x16xf32>
    %13 = tpu.transpose %12, [1, 0, 2] : vector<16x4x16xf32> -> vector<4x16x16xf32>
    "tpu.trace_start"() <{level = 10 : i32, message = "hqd,hkd->hqk"}> : () -> ()
    %cst_10 = arith.constant dense<0.000000e+00> : vector<4x16x16xf32>
    %14 = tpu.matmul %9, %11, %cst_10 {dimension_numbers = #tpu.dot_dimension_numbers<[2], [2], [1], [1], [0, 0, 0, 1, 1, 1], [0], [0]>} : vector<4x16x16xf32>, vector<4x16x16xf32>, vector<4x16x16xf32> -> vector<4x16x16xf32>
    "tpu.trace_stop"() : () -> ()
    %c0_11 = arith.constant 0 : index
    %c0_12 = arith.constant 0 : index
    %c0_13 = arith.constant 0 : index
    %c0_14 = arith.constant 0 : index
    %15 = vector.load %arg8[%c0_11, %c0_12, %c0_13, %c0_14] : memref<1x4x16x16xf32, #tpu.memory_space<vmem>>, vector<1x4x16x16xf32>
    %16 = vector.shape_cast %15 : vector<1x4x16x16xf32> to vector<4x16x16xf32>
    %17 = arith.addf %14, %16 : vector<4x16x16xf32>
    %cst_15 = arith.constant dense<0xFF800000> : vector<4x16xf32>
    %18 = vector.multi_reduction <maximumf>, %17, %cst_15 [2] : vector<4x16x16xf32> to vector<4x16xf32>
    %19 = vector.shape_cast %18 : vector<4x16xf32> to vector<4x16x1xf32>
    %20 = vector.broadcast %19 : vector<4x16x1xf32> to vector<4x16x16xf32>
    %21 = arith.subf %17, %20 : vector<4x16x16xf32>
    %22 = math.exp %21 : vector<4x16x16xf32>
    %cst_16 = arith.constant dense<0.000000e+00> : vector<4x16xf32>
    %23 = vector.multi_reduction <add>, %22, %cst_16 [2] : vector<4x16x16xf32> to vector<4x16xf32>
    %24 = vector.shape_cast %23 : vector<4x16xf32> to vector<4x16x1xf32>
    %25 = vector.broadcast %24 : vector<4x16x1xf32> to vector<4x16x16xf32>
    %26 = arith.divf %22, %25 : vector<4x16x16xf32>
    "tpu.trace_start"() <{level = 10 : i32, message = "hqk,hkd->hqd"}> : () -> ()
    %cst_17 = arith.constant dense<0.000000e+00> : vector<4x16x16xf32>
    %27 = tpu.matmul %26, %13, %cst_17 {dimension_numbers = #tpu.dot_dimension_numbers<[2], [1], [1], [2], [0, 0, 0, 1, 1, 2], [0], [0]>} : vector<4x16x16xf32>, vector<4x16x16xf32>, vector<4x16x16xf32> -> vector<4x16x16xf32>
    "tpu.trace_stop"() : () -> ()
    %28 = tpu.transpose %27, [1, 0, 2] : vector<4x16x16xf32> -> vector<16x4x16xf32>
    %29 = vector.shape_cast %28 : vector<16x4x16xf32> to vector<16x64xf32>
    %cst_18 = arith.constant dense<0.000000e+00> : vector<16xf32>
    %30 = vector.multi_reduction <add>, %29, %cst_18 [1] : vector<16x64xf32> to vector<16xf32>
    %31 = vector.shape_cast %30 : vector<16xf32> to vector<16x1xf32>
    %cst_19 = arith.constant 6.400000e+01 : f32
    %32 = vector.broadcast %cst_19 : f32 to vector<16x1xf32>
    %33 = arith.divf %31, %32 : vector<16x1xf32>
    %34 = vector.broadcast %33 : vector<16x1xf32> to vector<16x64xf32>
    %35 = arith.subf %29, %34 : vector<16x64xf32>
    %36 = arith.mulf %35, %35 : vector<16x64xf32>
    %cst_20 = arith.constant dense<0.000000e+00> : vector<16xf32>
    %37 = vector.multi_reduction <add>, %36, %cst_20 [1] : vector<16x64xf32> to vector<16xf32>
    %38 = vector.shape_cast %37 : vector<16xf32> to vector<16x1xf32>
    %cst_21 = arith.constant 6.400000e+01 : f32
    %39 = vector.broadcast %cst_21 : f32 to vector<16x1xf32>
    %40 = arith.divf %38, %39 : vector<16x1xf32>
    %41 = vector.broadcast %33 : vector<16x1xf32> to vector<16x64xf32>
    %42 = arith.subf %29, %41 : vector<16x64xf32>
    %cst_22 = arith.constant 9.99999974E-6 : f32
    %43 = vector.broadcast %cst_22 : f32 to vector<16x1xf32>
    %44 = arith.addf %40, %43 : vector<16x1xf32>
    %45 = math.rsqrt %44 : vector<16x1xf32>
    %46 = vector.broadcast %45 : vector<16x1xf32> to vector<16x64xf32>
    %47 = arith.mulf %42, %46 : vector<16x64xf32>
    %c0_23 = arith.constant 0 : index
    %c0_24 = arith.constant 0 : index
    %48 = vector.load %arg6[%c0_23, %c0_24] : memref<1x64xf32, #tpu.memory_space<vmem>>, vector<1x64xf32>
    %49 = vector.broadcast %48 : vector<1x64xf32> to vector<16x64xf32>
    %50 = arith.mulf %47, %49 : vector<16x64xf32>
    %c0_25 = arith.constant 0 : index
    %c0_26 = arith.constant 0 : index
    %51 = vector.load %arg7[%c0_25, %c0_26] : memref<1x64xf32, #tpu.memory_space<vmem>>, vector<1x64xf32>
    %52 = vector.broadcast %51 : vector<1x64xf32> to vector<16x64xf32>
    %53 = arith.addf %50, %52 : vector<16x64xf32>
    %c0_27 = arith.constant 0 : index
    %c0_28 = arith.constant 0 : index
    %54 = vector.load %arg5[%c0_27, %c0_28] : memref<64x64xf32, #tpu.memory_space<vmem>>, vector<64x64xf32>
    %cst_29 = arith.constant dense<0.000000e+00> : vector<16x64xf32>
    %55 = tpu.matmul %53, %54, %cst_29 {dimension_numbers = #tpu.dot_dimension_numbers<[1], [0], [0], [1], [0, 0, 1, 1], [], []>} : vector<16x64xf32>, vector<64x64xf32>, vector<16x64xf32> -> vector<16x64xf32>
    %56 = vector.shape_cast %55 : vector<16x64xf32> to vector<2x8x64xf32>
    %c0_30 = arith.constant 0 : index
    %c0_31 = arith.constant 0 : index
    %c0_32 = arith.constant 0 : index
    %57 = vector.load %arg9[%c0_30, %c0_31, %c0_32] : memref<2x8x64xf32, #tpu.memory_space<vmem>>, vector<2x8x64xf32>
    tpu.vector_store %arg9[%c0_30, %c0_31, %c0_32], %56 {strides = array<i32>} : memref<2x8x64xf32, #tpu.memory_space<vmem>>, vector<2x8x64xf32>,
    return
  }
  func.func @transform_0(%arg0: i32) -> (i32, i32, i32) {
    %c0_i32 = arith.constant 0 : i32
    %c0_i32_0 = arith.constant 0 : i32
    %c0_i32_1 = arith.constant 0 : i32
    return %arg0, %c0_i32, %c0_i32_0 : i32, i32, i32
  }
  func.func @transform_1(%arg0: i32) -> (i32, i32) {
    %c0_i32 = arith.constant 0 : i32
    %c0_i32_0 = arith.constant 0 : i32
    %c0_i32_1 = arith.constant 0 : i32
    return %c0_i32, %c0_i32_0 : i32, i32
  }
  func.func @transform_2(%arg0: i32) -> (i32, i32) {
    %c0_i32 = arith.constant 0 : i32
    %c0_i32_0 = arith.constant 0 : i32
    %c0_i32_1 = arith.constant 0 : i32
    return %c0_i32, %c0_i32_0 : i32, i32
  }
  func.func @transform_3(%arg0: i32) -> (i32, i32) {
    %c0_i32 = arith.constant 0 : i32
    %c0_i32_0 = arith.constant 0 : i32
    %c0_i32_1 = arith.constant 0 : i32
    return %c0_i32, %c0_i32_0 : i32, i32
  }
  func.func @transform_4(%arg0: i32) -> (i32, i32) {
    %c0_i32 = arith.constant 0 : i32
    %c0_i32_0 = arith.constant 0 : i32
    %c0_i32_1 = arith.constant 0 : i32
    return %c0_i32, %c0_i32_0 : i32, i32
  }
  func.func @transform_5(%arg0: i32) -> (i32, i32) {
    %c0_i32 = arith.constant 0 : i32
    %c0_i32_0 = arith.constant 0 : i32
    %c0_i32_1 = arith.constant 0 : i32
    return %c0_i32, %c0_i32_0 : i32, i32
  }
  func.func @transform_6(%arg0: i32) -> (i32, i32) {
    %c0_i32 = arith.constant 0 : i32
    %c0_i32_0 = arith.constant 0 : i32
    %c0_i32_1 = arith.constant 0 : i32
    return %c0_i32, %c0_i32_0 : i32, i32
  }
  func.func @transform_7(%arg0: i32) -> (i32, i32, i32, i32) {
    %c0_i32 = arith.constant 0 : i32
    %c0_i32_0 = arith.constant 0 : i32
    %c0_i32_1 = arith.constant 0 : i32
    %c0_i32_2 = arith.constant 0 : i32
    return %arg0, %c0_i32, %c0_i32_0, %c0_i32_1 : i32, i32, i32, i32
  }
  func.func @transform_8(%arg0: i32) -> (i32, i32, i32) {
    %c0_i32 = arith.constant 0 : i32
    %c0_i32_0 = arith.constant 0 : i32
    %c0_i32_1 = arith.constant 0 : i32
    return %arg0, %c0_i32, %c0_i32_0 : i32, i32, i32
  }
}

</mosaic_0001>

<bundles_post_ra>
// kernel: tpu_custom_call.1
= control target key start
LH: loop header
LB: loop body
LE: loop exit
PB: predicated region body
PF: predicated region fallthrough
CT: control target
= control target key end

     0   :  { %13 = vsyncpa [#allocation3], 0  ;;  %s3579_s0 = inlined_call_operand.hbm [shape: f32[2,8,64], index: 0, kind: input, shape index: {}]   ;;  %s3580_s1 = inlined_call_operand.hbm [shape: f32[64,64], index: 1, kind: input, shape index: {}]   ;;  %s3581_s2 = inlined_call_operand.hbm [shape: f32[64,64], index: 2, kind: input, shape index: {}]   ;;  %s3582_s3 = inlined_call_operand.hbm [shape: f32[64,64], index: 3, kind: input, shape index: {}]   ;;  %s3583_s4 = inlined_call_operand.hbm [shape: f32[64,64], index: 4, kind: input, shape index: {}]   ;;  %s3584_s5 = inlined_call_operand.vmem [shape: f32[1,64], index: 5, kind: input, shape index: {}]   ;;  %s3585_s6 = inlined_call_operand.vmem [shape: f32[1,64], index: 6, kind: input, shape index: {}]   ;;  %s3586_s7 = inlined_call_operand.hbm [shape: f32[1,4,16,16], index: 7, kind: input, shape index: {}]   ;;  %s3587_s8 = inlined_call_operand.hbm [shape: f32[2,8,64], index: 8, kind: output, shape index: {}]  }
   0x1   :  { %14 = vsyncpa [#allocation6], 0 }
   0x2   :  { %15 = vsyncpa [#allocation9], 0 }
   0x3   :  { %16 = vsyncpa [#allocation12], 0 }
   0x4   :  { %17 = vsyncpa [#allocation4], 0  ;;  %s3050_s27 = smov [#allocation5]   ;;  %s3051_s29 = smov [#allocation8]  }
   0x5   :  { %s35_s28 = sshll.u32 %s3050_s27, 4  ;;  %s59_s30 = sshll.u32 %s3051_s29, 4  ;;  %s36_s28 = int_to_ptr.vmem [resolvable:$true] %s35_s28  ;;  %s3112_s30 = int_to_ptr.vmem [resolvable:$true] %s59_s30 }
   0x6   :  { %s2886_s11 = scalar_lea.hbm %s3580_s1, 1024 }
   0x7   :  { %p2887_p0 = scmp.ne.s32.totalorder %s3580_s1, %s2886_s11  ;;  %p2890_p1 = scmp.lt.u32.totalorder %s2886_s11, %s3580_s1 }
   0x9   :  { %p2892_p2 = pnand %p2890_p1, %p2887_p0 }
   0xb   :  { %2895 = shalt.err (!%p2892_p2)
}
   0xc   :  { %s2896_s16 = scalar_lea.vmem %s36_s28, 1024  ;;  %p2901_p4 = scmp.lt.s32.totalorder %s36_s28, %s36_s28 }
   0xd   :  { %p2897_p3 = scmp.ne.s32.totalorder %s36_s28, %s2896_s16  ;;  %p2902_p5 = scmp.lt.s32.totalorder %s2896_s16, %s2896_s16 }
   0xf   :  { %p2903_p6 = por %p2902_p5, %p2901_p4 }
  0x11   :  { %p2904_p7 = pnand %p2903_p6, %p2897_p3 }
  0x13   :  { %2907 = shalt.err (!%p2904_p7)
}
  0x14   :  { %s3052_s17 = smov 128   ;;  %s3053_s18 = smov 8  }
  0x15   :  { %41 = dma.hbm_to_vmem [thread:$0]  %s3580_s1, 1024, %s36_s28, [#allocation6], %s3052_s17, %s3052_s17, %s3053_s18  }
  0x16   :  { %s2908_s23 = scalar_lea.hbm %s3582_s3, 1024 }
  0x17   :  { %p2909_p8 = scmp.ne.s32.totalorder %s3582_s3, %s2908_s23  ;;  %p2912_p9 = scmp.lt.u32.totalorder %s2908_s23, %s3582_s3 }
  0x19   :  { %p2914_p10 = pnand %p2912_p9, %p2909_p8 }
  0x1b   :  { %2917 = shalt.err (!%p2914_p10)
}
  0x1c   :  { %s2918_s29 = scalar_lea.vmem %s3112_s30, 1024  ;;  %p2923_p12 = scmp.lt.s32.totalorder %s3112_s30, %s3112_s30 }
  0x1d   :  { %p2919_p11 = scmp.ne.s32.totalorder %s3112_s30, %s2918_s29  ;;  %p2924_p13 = scmp.lt.s32.totalorder %s2918_s29, %s2918_s29 }
  0x1f   :  { %p2925_p0 = por %p2924_p13, %p2923_p12 }
  0x21   :  { %p2926_p1 = pnand %p2925_p0, %p2919_p11 }
  0x23   :  { %2929 = shalt.err (!%p2926_p1)
}
  0x24   :  { %65 = dma.hbm_to_vmem [thread:$0]  %s3582_s3, 1024, %s3112_s30, [#allocation9], %s3052_s17, %s3052_s17, %s3053_s18  }
  0x25   :  { %s3054_s9 = smov [#allocation2]   ;;  %s3055_s11 = smov [#allocation7]  }
  0x26   :  { %s23_s10 = sshll.u32 %s3054_s9, 4  ;;  %s47_s12 = sshll.u32 %s3055_s11, 4  ;;  %s24_s10 = int_to_ptr.vmem [resolvable:$true] %s23_s10  ;;  %s3149_s12 = int_to_ptr.vmem [resolvable:$true] %s47_s12 }
  0x27   :  { %s2930_s15 = scalar_lea.hbm %s3579_s0, 256 }
  0x28   :  { %p2931_p2 = scmp.ne.s32.totalorder %s3579_s0, %s2930_s15  ;;  %p2934_p3 = scmp.lt.u32.totalorder %s2930_s15, %s3579_s0 }
  0x2a   :  { %p2936_p4 = pnand %p2934_p3, %p2931_p2 }
  0x2c   :  { %2939 = shalt.err (!%p2936_p4)
}
  0x2d   :  { %s2940_s3 = scalar_lea.vmem %s24_s10, 256  ;;  %p2945_p6 = scmp.lt.s32.totalorder %s24_s10, %s24_s10 }
  0x2e   :  { %p2941_p5 = scmp.ne.s32.totalorder %s24_s10, %s2940_s3  ;;  %p2946_p7 = scmp.lt.s32.totalorder %s2940_s3, %s2940_s3 }
  0x30   :  { %p2947_p8 = por %p2946_p7, %p2945_p6 }
  0x32   :  { %p2948_p9 = pnand %p2947_p8, %p2941_p5 }
  0x34   :  { %2951 = shalt.err (!%p2948_p9)
}
  0x35   :  { %29 = dma.hbm_to_vmem [thread:$0]  %s3579_s0, 256, %s24_s10, [#allocation3], %s3052_s17, %s3052_s17, %s3053_s18  }
  0x36   :  { %s2952_s25 = scalar_lea.hbm %s3581_s2, 1024 }
  0x37   :  { %p2953_p10 = scmp.ne.s32.totalorder %s3581_s2, %s2952_s25  ;;  %p2956_p11 = scmp.lt.u32.totalorder %s2952_s25, %s3581_s2 }
  0x39   :  { %p2958_p12 = pnand %p2956_p11, %p2953_p10 }
  0x3b   :  { %2961 = shalt.err (!%p2958_p12)
}
  0x3c   :  { %s2962_s28 = scalar_lea.vmem %s3149_s12, 1024  ;;  %p2967_p0 = scmp.lt.s32.totalorder %s3149_s12, %s3149_s12 }
  0x3d   :  { %p2963_p13 = scmp.ne.s32.totalorder %s3149_s12, %s2962_s28  ;;  %p2968_p1 = scmp.lt.s32.totalorder %s2962_s28, %s2962_s28 }
  0x3f   :  { %p2969_p2 = por %p2968_p1, %p2967_p0 }
  0x41   :  { %p2970_p3 = pnand %p2969_p2, %p2963_p13 }
  0x43   :  { %2973 = shalt.err (!%p2970_p3)
}
  0x44   :  { %53 = dma.hbm_to_vmem [thread:$0]  %s3581_s2, 1024, %s3149_s12, [#allocation6], %s3052_s17, %s3052_s17, %s3053_s18  }
  0x45   :  { %s3056_s10 = smov [#allocation10]   ;;  %s3057_s13 = smov [#allocation11]  }
  0x46   :  { %s71_s11 = sshll.u32 %s3056_s10, 4  ;;  %s87_s14 = sshll.u32 %s3057_s13, 4  ;;  %s72_s11 = int_to_ptr.vmem [resolvable:$true] %s71_s11  ;;  %s3186_s14 = int_to_ptr.vmem [resolvable:$true] %s87_s14 }
  0x47   :  { %s2974_s19 = scalar_lea.hbm %s3583_s4, 1024 }
  0x48   :  { %p2975_p4 = scmp.ne.s32.totalorder %s3583_s4, %s2974_s19  ;;  %p2978_p5 = scmp.lt.u32.totalorder %s2974_s19, %s3583_s4 }
  0x4a   :  { %p2980_p6 = pnand %p2978_p5, %p2975_p4 }
  0x4c   :  { %2983 = shalt.err (!%p2980_p6)
}
  0x4d   :  { %s2984_s2 = scalar_lea.vmem %s72_s11, 1024  ;;  %p2989_p8 = scmp.lt.s32.totalorder %s72_s11, %s72_s11 }
  0x4e   :  { %p2985_p7 = scmp.ne.s32.totalorder %s72_s11, %s2984_s2  ;;  %p2990_p9 = scmp.lt.s32.totalorder %s2984_s2, %s2984_s2 }
  0x50   :  { %p2991_p10 = por %p2990_p9, %p2989_p8 }
  0x52   :  { %p2992_p11 = pnand %p2991_p10, %p2985_p7 }
  0x54   :  { %2995 = shalt.err (!%p2992_p11)
}
  0x55   :  { %77 = dma.hbm_to_vmem [thread:$0]  %s3583_s4, 1024, %s72_s11, [#allocation9], %s3052_s17, %s3052_s17, %s3053_s18  }
  0x56   :  { %s2996_s25 = scalar_lea.hbm %s3586_s7, 1024 }
  0x57   :  { %p2997_p12 = scmp.ne.s32.totalorder %s3586_s7, %s2996_s25  ;;  %p3000_p13 = scmp.lt.u32.totalorder %s2996_s25, %s3586_s7 }
  0x59   :  { %p3002_p0 = pnand %p3000_p13, %p2997_p12 }
  0x5b   :  { %3005 = shalt.err (!%p3002_p0)
}
  0x5c   :  { %s3006_s28 = scalar_lea.vmem %s3186_s14, 1024  ;;  %p3011_p2 = scmp.lt.s32.totalorder %s3186_s14, %s3186_s14 }
  0x5d   :  { %p3007_p1 = scmp.ne.s32.totalorder %s3186_s14, %s3006_s28  ;;  %p3012_p3 = scmp.lt.s32.totalorder %s3006_s28, %s3006_s28 }
  0x5f   :  { %p3013_p4 = por %p3012_p3, %p3011_p2 }
  0x61   :  { %p3014_p5 = pnand %p3013_p4, %p3007_p1 }
  0x63   :  { %3017 = shalt.err (!%p3014_p5)
}
  0x64   :  { %93 = dma.hbm_to_vmem [thread:$0]  %s3586_s7, 1024, %s3186_s14, [#allocation12], %s3052_s17, %s3052_s17, %s3053_s18  }
  0x65   :  { %3040 = dma.done.wait [#allocation3], 256  }
  0x66   :  { %3041 = vsyncadd [#allocation3], 4294967040 }
  0x67   :  { %3042 = dma.done.wait [#allocation6], 2048  }
  0x68   :  { %3043 = vsyncadd [#allocation6], 4294965248 }
  0x69   :  { %3044 = dma.done.wait [#allocation9], 2048  }
  0x6a   :  { %3045 = vsyncadd [#allocation9], 4294965248 }
  0x6b   :  { %3046 = dma.done.wait [#allocation12], 1024  }
  0x6c   :  { %3047 = vsyncadd [#allocation12], 4294966272  ;;  %v204_v0 = vld [vmem:[#allocation7] sm:$0xff]  ;;  %v205_v1 = vld [vmem:[#allocation7 + $0x8] sm:$0xff]  ;;  %vm122_vm0 = vcmask 523264   ;;  %s3058_s7 = smov 96   ;;  %v395_v44 = vlaneseq }
  0x6d   :  { %v206_v2 = vld [vmem:[#allocation7 + $0x10] sm:$0xff]  ;;  %v2745_v3 = vpack.c.bf16 %v205_v1, %v204_v0  ;;  %v207_v4 = vld [vmem:[#allocation7 + $0x18] sm:$0xff]  ;;  %v208_v5 = vld [vmem:[#allocation7 + $0x20] sm:$0xff]  ;;  %s3059_s9 = smov 112   ;;  %s3060_s10 = smov 80   ;;  %vm1254_vm1 = vcmask 130048  }
  0x6e   :  { %v2749_v6 = vpack.c.bf16 %v207_v4, %v206_v2  ;;  %v209_v7 = vld [vmem:[#allocation7 + $0x28] sm:$0xff]  ;;  %v114_v8 = vld [vmem:[#allocation5] sm:$0xff]  ;;  %v116_v11 = vld [vmem:[#allocation5 + $0x10] sm:$0xff]  ;;  %v3061_v42 = vmov 1983009808   ;;  %v396_v48 = vshrl.u32 %v395_v44, 7 }
  0x6f   :  { %v115_v9 = vld [vmem:[#allocation5 + $0x8] sm:$0xff]  ;;  %2746 = vmatprep.subr.bf16.mxu1 %v2745_v3  ;;  %v117_v12 = vld [vmem:[#allocation5 + $0x18] sm:$0xff]  ;;  %v112_v14 = vld [vmem:[#allocation2] sm:$0xff]  ;;  %v2753_v16 = vpack.c.bf16 %v209_v7, %v208_v5  ;;  %v393_v43 = vunpack.c.l.s4 %v3061_v42  ;;  %v3062_v45 = vmov 1934713408   ;;  %s3063_s11 = smov 32  }
  0x70   :  { %v2729_v10 = vpack.c.bf16 %v115_v9, %v114_v8  ;;  %2748 = vmatpush3.bf16.msra.mxu1 %v2745_v3  ;;  %v2733_v13 = vpack.c.bf16 %v117_v12, %v116_v11  ;;  %v118_v15 = vld [vmem:[#allocation5 + $0x20] sm:$0xff]  ;;  %v119_v17 = vld [vmem:[#allocation5 + $0x28] sm:$0xff]  ;;  %v210_v18 = vld [vmem:[#allocation7 + $0x30] sm:$0xff]  ;;  %2632 = vmatprep.mubr.msk.f32.mxu1 %vm122_vm0, %v112_v14  ;;  %v425_v46 = vunpack.c.l.s4 %v3062_v45  ;;  %s3064_s13 = smov 16   ;;  %s3065_s14 = smov 48   ;;  %vm2316_vm3 = vcmask 392192  }
  0x71   :  { %2750 = vmatprep.subr.bf16.mxu1 %v2749_v6  ;;  %v211_v19 = vld [vmem:[#allocation7 + $0x38] sm:$0xff]  ;;  %v2737_v20 = vpack.c.bf16 %v119_v17, %v118_v15  ;;  %2613 = vmatprep.mubr.msk.f32.mxu0 %vm122_vm0, %v112_v14  ;;  %v120_v21 = vld [vmem:[#allocation5 + $0x30] sm:$0xff]  ;;  %v287_v30 = vld [vmem:[#allocation8] sm:$0xff]  ;;  %v394_v47 = vunpack.c.0.s8 %v393_v43  ;;  %vm2313_vm4 = vcmask 261120   ;;  %s3066_s21 = smov [#allocation13]  }
  0x72   :  { %2730 = vmatprep.subr.bf16.mxu0 %v2729_v10  ;;  %v121_v22 = vld [vmem:[#allocation5 + $0x38] sm:$0xff]  ;;  %v2757_v23 = vpack.c.bf16 %v211_v19, %v210_v18  ;;  %v288_v31 = vld [vmem:[#allocation8 + $0x8] sm:$0xff]  ;;  %v289_v32 = vld [vmem:[#allocation8 + $0x10] sm:$0xff]  ;;  %v426_v51 = vunpack.c.0.s8 %v425_v46  ;;  %s2460_s3 = sshll.u32 %s3066_s21, 4  ;;  %s2461_s3 = int_to_ptr.vmem [resolvable:$true] %s2460_s3 }
  0x73   :  { %2732 = vmatpush3.bf16.msra.mxu0 %v2729_v10  ;;  %v2741_v24 = vpack.c.bf16 %v121_v22, %v120_v21  ;;  %v113_v25 = vld [vmem:[#allocation2 + $0x8] sm:$0xff]  ;;  %v2761_v33 = vpack.c.bf16 %v288_v31, %v287_v30  ;;  %v291_v36 = vld [vmem:[#allocation8 + $0x20] sm:$0xff]  ;;  %v292_v37 = vld [vmem:[#allocation8 + $0x28] sm:$0xff]  ;;  %v3256_v52 = vsub.s32 %v394_v47, %v396_v48  ;;  %p3023_p7 = scmp.lt.s32.totalorder %s2461_s3, %s2461_s3 }
  0x74   :  { %2734 = vmatprep.subr.bf16.mxu0 %v2733_v13  ;;  %2752 = vmatpush3.bf16.msra.mxu1 %v2749_v6  ;;  %v290_v34 = vld [vmem:[#allocation8 + $0x18] sm:$0xff]  ;;  %v2769_v38 = vpack.c.bf16 %v292_v37, %v291_v36  ;;  %v293_v39 = vld [vmem:[#allocation8 + $0x30] sm:$0xff]  ;;  %v3258_v59 = vsub.s32 %v426_v51, %v396_v48  ;;  %vm3352_vm2 = vmpackc.low %vm1254_vm1, %vm1254_vm1 }
  0x75   :  { %2754 = vmatprep.subr.bf16.mxu1 %v2753_v16  ;;  %v2765_v35 = vpack.c.bf16 %v290_v34, %v289_v32  ;;  %v294_v40 = vld [vmem:[#allocation8 + $0x38] sm:$0xff] }
  0x76   :  { %v2773_v41 = vpack.c.bf16 %v294_v40, %v293_v39 }
  0x77   :  { %2736 = vmatpush3.bf16.msra.mxu0 %v2733_v13 }
  0x78   :  { %2738 = vmatprep.subr.bf16.mxu0 %v2737_v20  ;;  %2756 = vmatpush3.bf16.msra.mxu1 %v2753_v16 }
  0x79   :  { %2758 = vmatprep.subr.bf16.mxu1 %v2757_v23 }
  0x7b   :  { %2740 = vmatpush3.bf16.msra.mxu0 %v2737_v20 }
  0x7c   :  { %2742 = vmatprep.subr.bf16.mxu0 %v2741_v24  ;;  %2760 = vmatpush3.bf16.msra.mxu1 %v2757_v23 }
  0x7f   :  { %2744 = vmatpush3.bf16.msra.mxu0 %v2741_v24  ;;  %2633 = vmatmul.mubr.msk.f32.vlgmr.msra.gmra.mrb[0].mxu1 %vm122_vm0, %v113_v25 }
  0x80   :  { %2762 = vmatprep.subr.bf16.mxu0 %v2761_v33 }
  0x82   :  { %2614 = vmatmul.mubr.msk.f32.vlgmr.msra.gmra.mrb[0].mxu0 %vm122_vm0, %v113_v25 }
  0x83   :  { %2651 = vmatprep.mubr.msk.f32.mxu0 %vm122_vm0, %v112_v14  ;;  %2764 = vmatpush3.bf16.msra.mxu0 %v2761_v33 }
  0x84   :  { %2766 = vmatprep.subr.bf16.mxu0 %v2765_v35 }
  0x87   :  { %2768 = vmatpush3.bf16.msra.mxu0 %v2765_v35 }
  0x88   :  { %2770 = vmatprep.subr.bf16.mxu0 %v2769_v38 }
  0x8b   :  { %2772 = vmatpush3.bf16.msra.mxu0 %v2769_v38 }
  0x8c   :  { %2774 = vmatprep.subr.bf16.mxu0 %v2773_v41 }
  0x8f   :  { %2776 = vmatpush3.bf16.msra.mxu0 %v2773_v41 }
  0x92   :  { %2652 = vmatmul.mubr.msk.f32.vlgmr.msra.gmra.mrb[2].mxu0 %vm122_vm0, %v113_v25 }
 0x152   :  { %v2634_v26 = vpop.f32.mrb[0].mxu1 }
 0x153   :  { %672 = vrot.lane.b32.xlu1 %v2634_v26, %s3058_s7  ;;  %666 = vrot.lane.b32.xlu0 %v2634_v26, %s3059_s9  ;;  %v3230_v27 = vpop.f32.mrb[1].mxu1 }
 0x155   :  { %v3232_v28 = vpop.f32.mrb[0].mxu0 }
 0x156   :  { %v3234_v29 = vpop.f32.mrb[1].mxu0 }
 0x157   :  { %678 = vrot.lane.b32.xlu1 %v2634_v26, %s3060_s10  ;;  %664 = vrot.lane.b32.xlu0 %v3230_v27, %s3059_s9 }
 0x15b   :  { %670 = vrot.lane.b32.xlu1 %v3230_v27, %s3058_s7  ;;  %676 = vrot.lane.b32.xlu0 %v3230_v27, %s3060_s10 }
 0x15f   :  { %374 = vrot.lane.b32.xlu1 %v3232_v28, %s3059_s9  ;;  %372 = vrot.lane.b32.xlu0 %v3234_v29, %s3059_s9 }
 0x163   :  { %378 = vrot.lane.b32.xlu1 %v3234_v29, %s3058_s7  ;;  %384 = vrot.lane.b32.xlu0 %v3234_v29, %s3060_s10 }
 0x167   :  { %386 = vrot.lane.b32.xlu1 %v3232_v28, %s3060_s10  ;;  %380 = vrot.lane.b32.xlu0 %v3232_v28, %s3058_s7 }
 0x1c5   :  { %v673_v49 = vpop.permute.xlu1 %672  ;;  %v667_v50 = vpop.permute.xlu0 %666 }
 0x1c6   :  { %v750_v53 = vcombine.low %v2634_v26, %v673_v49  ;;  %v751_v54 = vcombine.high %v2634_v26, %v673_v49 }
 0x1c8   :  { %v758_v60 = vrot.slane %v750_v53, %v3256_v52  ;;  %v765_v61 = vrot.slane %v751_v54, %v3256_v52 }
 0x1c9   :  { %v679_v55 = vpop.permute.xlu1 %678  ;;  %v665_v56 = vpop.permute.xlu0 %664 }
 0x1ca   :  { %v766_v57 = vcombine.low %v667_v50, %v679_v55  ;;  %v767_v58 = vcombine.high %v667_v50, %v679_v55 }
 0x1cc   :  { %v774_v62 = vrot.slane %v766_v57, %v3256_v52  ;;  %v781_v63 = vrot.slane %v767_v58, %v3256_v52 }
 0x1cd   :  { %v671_v0 = vpop.permute.xlu1 %670  ;;  %v677_v1 = vpop.permute.xlu0 %676 }
 0x1ce   :  { %v782_v2 = vcombine.low %v758_v60, %v774_v62  ;;  %v783_v3 = vcombine.high %v758_v60, %v774_v62  ;;  %v798_v4 = vcombine.low %v765_v61, %v781_v63  ;;  %v799_v5 = vcombine.high %v765_v61, %v781_v63 }
 0x1cf   :  { %v682_v6 = vcombine.low %v3230_v27, %v671_v0  ;;  %v683_v7 = vcombine.high %v3230_v27, %v671_v0  ;;  %v698_v8 = vcombine.low %v665_v56, %v677_v1  ;;  %v699_v9 = vcombine.high %v665_v56, %v677_v1 }
 0x1d0   :  { %v790_v10 = vrot.slane %v782_v2, %v3258_v59  ;;  %v797_v11 = vrot.slane %v783_v3, %v3258_v59  ;;  %v806_v12 = vrot.slane %v798_v4, %v3258_v59  ;;  %v813_v13 = vrot.slane %v799_v5, %v3258_v59 }
 0x1d1   :  { %v690_v14 = vrot.slane %v682_v6, %v3256_v52  ;;  %v697_v15 = vrot.slane %v683_v7, %v3256_v52  ;;  %v706_v16 = vrot.slane %v698_v8, %v3256_v52  ;;  %v713_v17 = vrot.slane %v699_v9, %v3256_v52  ;;  %v375_v18 = vpop.permute.xlu1 %374  ;;  %v373_v19 = vpop.permute.xlu0 %372 }
 0x1d2   :  { %v886_v20 = vcombine.low %v790_v10, %v797_v11  ;;  %v2487_v21 = vcombine.high %v790_v10, %v797_v11  ;;  %v902_v22 = vcombine.low %v806_v12, %v813_v13  ;;  %v2488_v23 = vcombine.high %v806_v12, %v813_v13 }
 0x1d3   :  { %v714_v24 = vcombine.low %v690_v14, %v706_v16  ;;  %v715_v25 = vcombine.high %v690_v14, %v706_v16  ;;  %v730_v26 = vcombine.low %v697_v15, %v713_v17  ;;  %v731_v27 = vcombine.high %v697_v15, %v713_v17 }
 0x1d4   :  { %v3275_v30 = vrot.slane %v886_v20, %v3256_v52  ;;  %v3278_v31 = vrot.slane %v2487_v21, %v3256_v52  ;;  %v3281_v32 = vrot.slane %v902_v22, %v3256_v52  ;;  %v3284_v33 = vrot.slane %v2488_v23, %v3256_v52 }
 0x1d5   :  { %v722_v34 = vrot.slane %v714_v24, %v3258_v59  ;;  %v729_v35 = vrot.slane %v715_v25, %v3258_v59  ;;  %v738_v36 = vrot.slane %v730_v26, %v3258_v59  ;;  %v745_v37 = vrot.slane %v731_v27, %v3258_v59  ;;  %v379_v38 = vpop.permute.xlu1 %378  ;;  %v385_v39 = vpop.permute.xlu0 %384 }
 0x1d6   :  { %v390_v40 = vcombine.low %v3234_v29, %v379_v38  ;;  %v391_v41 = vcombine.high %v3234_v29, %v379_v38  ;;  %v406_v42 = vcombine.low %v373_v19, %v385_v39  ;;  %v407_v43 = vcombine.high %v373_v19, %v385_v39 }
 0x1d7   :  { %v818_v44 = vcombine.low %v722_v34, %v729_v35  ;;  %v2485_v45 = vcombine.high %v722_v34, %v729_v35  ;;  %v834_v46 = vcombine.low %v738_v36, %v745_v37  ;;  %v2486_v47 = vcombine.high %v738_v36, %v745_v37 }
 0x1d8   :  { %v398_v48 = vrot.slane %v390_v40, %v3256_v52  ;;  %v405_v49 = vrot.slane %v391_v41, %v3256_v52  ;;  %v414_v50 = vrot.slane %v406_v42, %v3256_v52  ;;  %v421_v51 = vrot.slane %v407_v43, %v3256_v52 }
 0x1d9   :  { %v3297_v53 = vrot.slane %v818_v44, %v3256_v52  ;;  %v3300_v54 = vrot.slane %v2485_v45, %v3256_v52  ;;  %v3303_v29 = vrot.slane %v834_v46, %v3256_v52  ;;  %v3306_v55 = vrot.slane %v2486_v47, %v3256_v52  ;;  %v387_v56 = vpop.permute.xlu1 %386  ;;  %v381_v57 = vpop.permute.xlu0 %380 }
 0x1da   :  { %v422_v58 = vcombine.low %v398_v48, %v414_v50  ;;  %v423_v60 = vcombine.high %v398_v48, %v414_v50  ;;  %v438_v61 = vcombine.low %v405_v49, %v421_v51  ;;  %v439_v62 = vcombine.high %v405_v49, %v421_v51 }
 0x1db   :  { %v474_v63 = vcombine.low %v375_v18, %v387_v56  ;;  %v475_v0 = vcombine.high %v375_v18, %v387_v56  ;;  %v458_v1 = vcombine.low %v3232_v28, %v381_v57  ;;  %v459_v2 = vcombine.high %v3232_v28, %v381_v57 }
 0x1dc   :  { %v430_v3 = vrot.slane %v422_v58, %v3258_v59  ;;  %v437_v4 = vrot.slane %v423_v60, %v3258_v59  ;;  %v446_v5 = vrot.slane %v438_v61, %v3258_v59  ;;  %v453_v6 = vrot.slane %v439_v62, %v3258_v59 }
 0x1dd   :  { %v482_v7 = vrot.slane %v474_v63, %v3256_v52  ;;  %v489_v8 = vrot.slane %v475_v0, %v3256_v52  ;;  %v466_v9 = vrot.slane %v458_v1, %v3256_v52  ;;  %v473_v10 = vrot.slane %v459_v2, %v3256_v52 }
 0x1de   :  { %v526_v11 = vcombine.low %v430_v3, %v437_v4  ;;  %v2481_v12 = vcombine.high %v430_v3, %v437_v4  ;;  %v542_v28 = vcombine.low %v446_v5, %v453_v6  ;;  %v2482_v13 = vcombine.high %v446_v5, %v453_v6 }
 0x1df   :  { %v490_v14 = vcombine.low %v466_v9, %v482_v7  ;;  %v491_v15 = vcombine.high %v466_v9, %v482_v7  ;;  %v506_v16 = vcombine.low %v473_v10, %v489_v8  ;;  %v507_v17 = vcombine.high %v473_v10, %v489_v8 }
 0x1e0   :  { %v3319_v18 = vrot.slane %v526_v11, %v3256_v52  ;;  %v3322_v19 = vrot.slane %v2481_v12, %v3256_v52  ;;  %v3325_v20 = vrot.slane %v542_v28, %v3256_v52  ;;  %v3328_v21 = vrot.slane %v2482_v13, %v3256_v52 }
 0x1e1   :  { %v498_v22 = vrot.slane %v490_v14, %v3258_v59  ;;  %v505_v23 = vrot.slane %v491_v15, %v3258_v59  ;;  %v514_v24 = vrot.slane %v506_v16, %v3258_v59  ;;  %v521_v25 = vrot.slane %v507_v17, %v3258_v59 }
 0x1e2   :  { %v850_v26 = vcombine.low %v3297_v53, %v3300_v54  ;;  %v866_v27 = vcombine.low %v3303_v29, %v3306_v55  ;;  %v918_v34 = vcombine.low %v3275_v30, %v3278_v31  ;;  %v934_v35 = vcombine.low %v3281_v32, %v3284_v33 }
 0x1e3   :  { %v594_v36 = vcombine.low %v498_v22, %v505_v23  ;;  %v2483_v37 = vcombine.high %v498_v22, %v505_v23  ;;  %v610_v38 = vcombine.low %v514_v24, %v521_v25  ;;  %v2484_v39 = vcombine.high %v514_v24, %v521_v25  ;;  %v3408_v25 = vpop.f32.mrb[2].mxu0 }
 0x1e4   :  { %v858_v40 = vrot.slane %v850_v26, %v3258_v59  ;;  %v874_v41 = vrot.slane %v866_v27, %v3258_v59  ;;  %v926_v42 = vrot.slane %v918_v34, %v3258_v59  ;;  %v942_v43 = vrot.slane %v934_v35, %v3258_v59  ;;  %v3410_v26 = vpop.f32.mrb[3].mxu0  ;;  %v1247_v27 = vld [vmem:[#allocation11 + $0x8] sm:$0xff]  ;;  %v1246_v35 = vld [vmem:[#allocation11] sm:$0xff] }
 0x1e5   :  { %v601_v44 = vrot.slane %v594_v36, %v3256_v52  ;;  %v609_v45 = vrot.slane %v2483_v37, %v3256_v52  ;;  %v617_v46 = vrot.slane %v610_v38, %v3256_v52  ;;  %v625_v47 = vrot.slane %v2484_v39, %v3256_v52 }
 0x1e6   :  { %v882_v48 = vcombine.low %v858_v40, %v874_v41  ;;  %v950_v49 = vcombine.low %v926_v42, %v942_v43  ;;  %v883_v50 = vcombine.high %v858_v40, %v874_v41  ;;  %v951_v51 = vcombine.high %v926_v42, %v942_v43  ;;  %v1249_v40 = vld [vmem:[#allocation11 + $0x18] sm:$0xff]  ;;  %v1248_v41 = vld [vmem:[#allocation11 + $0x10] sm:$0xff] }
 0x1e7   :  { %v626_v56 = vcombine.low %v601_v44, %v609_v45  ;;  %v642_v57 = vcombine.low %v617_v46, %v625_v47  ;;  %v558_v62 = vcombine.low %v3319_v18, %v3322_v19  ;;  %v574_v63 = vcombine.low %v3325_v20, %v3328_v21 }
 0x1e8   :  { %v2777_v60 = vpack.c.bf16 %v950_v49, %v882_v48  ;;  %v2783_v61 = vpack.c.bf16 %v951_v51, %v883_v50  ;;  %v851_v2 = vcombine.high %v3297_v53, %v3300_v54  ;;  %v867_v3 = vcombine.high %v3303_v29, %v3306_v55  ;;  %v1250_v49 = vld [vmem:[#allocation11 + $0x20] sm:$0xff]  ;;  %v1251_v51 = vld [vmem:[#allocation11 + $0x28] sm:$0xff] }
 0x1e9   :  { %v634_v0 = vrot.slane %v626_v56, %v3258_v59  ;;  %v650_v1 = vrot.slane %v642_v57, %v3258_v59  ;;  %v566_v4 = vrot.slane %v558_v62, %v3258_v59  ;;  %v582_v5 = vrot.slane %v574_v63, %v3258_v59 }
 0x1ea   :  { %2779 = vmatprep.subr.msk.bf16.mxu1 %vm3352_vm2, %v2777_v60  ;;  %v919_v6 = vcombine.high %v3275_v30, %v3278_v31  ;;  %v935_v7 = vcombine.high %v3281_v32, %v3284_v33  ;;  %v865_v53 = vrot.slane %v851_v2, %v3258_v59  ;;  %v881_v54 = vrot.slane %v867_v3, %v3258_v59 }
 0x1eb   :  { %2782 = vmatpush3.bf16.xpose.msk.msra.mxu1 %vm3352_vm2, %v2777_v60  ;;  %v590_v29 = vcombine.low %v566_v4, %v582_v5  ;;  %v658_v31 = vcombine.low %v634_v0, %v650_v1  ;;  %v591_v12 = vcombine.high %v566_v4, %v582_v5  ;;  %v559_v28 = vcombine.high %v3319_v18, %v3322_v19 }
 0x1ec   :  { %2785 = vmatprep.subr.msk.bf16.mxu1 %vm3352_vm2, %v2783_v61  ;;  %v933_v55 = vrot.slane %v919_v6, %v3258_v59  ;;  %v949_v8 = vrot.slane %v935_v7, %v3258_v59  ;;  %v884_v9 = vcombine.low %v865_v53, %v881_v54  ;;  %v885_v30 = vcombine.high %v865_v53, %v881_v54 }
 0x1ed   :  { %2658 = vmatprep.mubr.msk.f32.mxu1 %vm1254_vm1, %v590_v29  ;;  %v575_v13 = vcombine.high %v3325_v20, %v3328_v21  ;;  %v573_v14 = vrot.slane %v559_v28, %v3258_v59  ;;  %v627_v16 = vcombine.high %v601_v44, %v609_v45  ;;  %v643_v17 = vcombine.high %v617_v46, %v625_v47 }
 0x1ee   :  { %v952_v32 = vcombine.low %v933_v55, %v949_v8  ;;  %v953_v33 = vcombine.high %v933_v55, %v949_v8  ;;  %v659_v18 = vcombine.high %v634_v0, %v650_v1  ;;  %v1253_v0 = vld [vmem:[#allocation11 + $0x38] sm:$0xff] }
 0x1ef   :  { %v589_v15 = vrot.slane %v575_v13, %v3258_v59  ;;  %v641_v20 = vrot.slane %v627_v16, %v3258_v59  ;;  %v657_v21 = vrot.slane %v643_v17, %v3258_v59 }
 0x1f0   :  { %v2789_v10 = vpack.c.bf16 %v952_v32, %v884_v9  ;;  %v2795_v11 = vpack.c.bf16 %v953_v33, %v885_v30 }
 0x1f1   :  { %v592_v19 = vcombine.low %v573_v14, %v589_v15  ;;  %v660_v22 = vcombine.low %v641_v20, %v657_v21  ;;  %v593_v23 = vcombine.high %v573_v14, %v589_v15  ;;  %v661_v24 = vcombine.high %v641_v20, %v657_v21 }
 0x1f2   :  { %2659 = vmatmul.mubr.msk.f32.vlgmr.msra.gmra.mrb[2].mxu1 %vm1254_vm1, %v658_v31 }
 0x1f3   :  { %2788 = vmatpush3.bf16.xpose.msk.msra.mxu1 %vm3352_vm2, %v2783_v61  ;;  %2665 = vmatprep.mubr.msk.f32.mxu1 %vm1254_vm1, %v591_v12  ;;  %v1252_v61 = vld [vmem:[#allocation11 + $0x30] sm:$0xff] }
 0x1f4   :  { %2791 = vmatprep.subr.msk.bf16.mxu1 %vm3352_vm2, %v2789_v10 }
 0x1fa   :  { %2666 = vmatmul.mubr.msk.f32.vlgmr.msra.gmra.mrb[4].mxu1 %vm1254_vm1, %v659_v18 }
 0x1fb   :  { %2794 = vmatpush3.bf16.xpose.msk.msra.mxu1 %vm3352_vm2, %v2789_v10  ;;  %2672 = vmatprep.mubr.msk.f32.mxu1 %vm1254_vm1, %v592_v19 }
 0x1fc   :  { %2797 = vmatprep.subr.msk.bf16.mxu1 %vm3352_vm2, %v2795_v11 }
 0x202   :  { %2673 = vmatmul.mubr.msk.f32.vlgmr.msra.gmra.mrb[6].mxu1 %vm1254_vm1, %v660_v22 }
 0x203   :  { %2800 = vmatpush3.bf16.xpose.msk.msra.mxu1 %vm3352_vm2, %v2795_v11  ;;  %2679 = vmatprep.mubr.msk.f32.mxu1 %vm1254_vm1, %v593_v23 }
 0x20a   :  { %2680 = vmatmul.mubr.msk.f32.vlgmr.msra.gmra.mrb[8].mxu1 %vm1254_vm1, %v661_v24 }
 0x2c5   :  { %v2660_v34 = vpop.f32.mrb[2].mxu1 }
 0x2c6   :  { %v1339_v36 = vadd.f32 %v2660_v34, %v1247_v27  ;;  %v1333_v37 = vpop.f32.mrb[3].mxu1 }
 0x2c7   :  { %v1334_v38 = vadd.f32 %v1333_v37, %v1246_v35 }
 0x2c8   :  { %v1606_v39 = vsel %vm1254_vm1, %v1339_v36, -inf }
 0x2c9   :  { %1607 = vmax.xlane.f32.xlu0 %v1606_v39  ;;  %v1603_v42 = vsel %vm1254_vm1, %v1334_v38, -inf }
 0x2cd   :  { %v2667_v43 = vpop.f32.mrb[4].mxu1  ;;  %1604 = vmax.xlane.f32.xlu0 %v1603_v42 }
 0x2ce   :  { %v1426_v44 = vadd.f32 %v2667_v43, %v1249_v40  ;;  %v1420_v45 = vpop.f32.mrb[5].mxu1 }
 0x2cf   :  { %v1421_v46 = vadd.f32 %v1420_v45, %v1248_v41 }
 0x2d0   :  { %v1612_v47 = vsel %vm1254_vm1, %v1426_v44, -inf }
 0x2d1   :  { %v1609_v48 = vsel %vm1254_vm1, %v1421_v46, -inf  ;;  %1613 = vmax.xlane.f32.xlu0 %v1612_v47 }
 0x2d2   :  { %1610 = vmax.xlane.f32.xlu1 %v1609_v48 }
 0x2d5   :  { %v2674_v50 = vpop.f32.mrb[6].mxu1 }
 0x2d6   :  { %v1507_v56 = vpop.f32.mrb[7].mxu1  ;;  %v1513_v58 = vadd.f32 %v2674_v50, %v1251_v51 }
 0x2d7   :  { %v1508_v57 = vadd.f32 %v1507_v56, %v1250_v49 }
 0x2d8   :  { %v1618_v63 = vsel %vm1254_vm1, %v1513_v58, -inf }
 0x2d9   :  { %v1615_v60 = vsel %vm1254_vm1, %v1508_v57, -inf }
 0x2da   :  { %1616 = vmax.xlane.f32.xlu1 %v1615_v60 }
 0x2dd   :  { %v2681_v62 = vpop.f32.mrb[8].mxu1 }
 0x2de   :  { %v1594_v1 = vpop.f32.mrb[9].mxu1  ;;  %1619 = vmax.xlane.f32.xlu1 %v1618_v63  ;;  %v1600_v3 = vadd.f32 %v2681_v62, %v1253_v0 }
 0x2df   :  { %v1595_v2 = vadd.f32 %v1594_v1, %v1252_v61 }
 0x2e0   :  { %v1624_v5 = vsel %vm1254_vm1, %v1600_v3, -inf }
 0x2e1   :  { %v1621_v4 = vsel %vm1254_vm1, %v1595_v2, -inf }
 0x2e2   :  { %1622 = vmax.xlane.f32.xlu0 %v1621_v4 }
 0x2e6   :  { %1625 = vmax.xlane.f32.xlu0 %v1624_v5 }
 0x2ef   :  { %956 = vrot.lane.b32.xlu1 %v3410_v26, %s3059_s9 }
 0x2f3   :  { %962 = vrot.lane.b32.xlu1 %v3410_v26, %s3058_s7 }
 0x2f7   :  { %964 = vrot.lane.b32.xlu1 %v3408_v25, %s3058_s7 }
 0x2fb   :  { %970 = vrot.lane.b32.xlu1 %v3408_v25, %s3060_s10 }
 0x2fc   :  { %958 = vrot.lane.b32.xlu0 %v3408_v25, %s3059_s9 }
 0x300   :  { %968 = vrot.lane.b32.xlu0 %v3410_v26, %s3060_s10 }
 0x356   :  { %v1608_v6 = vpop.xlane.xlu0 %1607 }
 0x357   :  { %v1628_v7 = vsub.f32 %v1339_v36, %v1608_v6 }
 0x359   :  { %v1637_v53 = vmul.f32 1.442695, %v1628_v7 }
 0x35a   :  { %v1605_v54 = vpop.xlane.xlu0 %1604 }
 0x35b   :  { %2850 = vpow2.f32 %v1637_v53  ;;  %v1627_v29 = vsub.f32 %v1334_v38, %v1605_v54 }
 0x35d   :  { %v1635_v55 = vmul.f32 1.442695, %v1627_v29 }
 0x35e   :  { %v1614_v8 = vpop.xlane.xlu0 %1613 }
 0x35f   :  { %2852 = vpow2.f32 %v1635_v55  ;;  %v1611_v9 = vpop.xlane.xlu1 %1610  ;;  %v1630_v30 = vsub.f32 %v1426_v44, %v1614_v8 }
 0x360   :  { %v1629_v31 = vsub.f32 %v1421_v46, %v1611_v9 }
 0x361   :  { %v1641_v32 = vmul.f32 1.442695, %v1630_v30 }
 0x362   :  { %v1639_v33 = vmul.f32 1.442695, %v1629_v31 }
 0x363   :  { %2854 = vpow2.f32 %v1641_v32 }
 0x364   :  { %2856 = vpow2.f32 %v1639_v33 }
 0x365   :  { %v3432_v10 = vpop.eup %2850 }
 0x366   :  { %v1654_v11 = vsel %vm1254_vm1, %v3432_v10, 0.0 }
 0x367   :  { %v1617_v12 = vpop.xlane.xlu1 %1616  ;;  %1655 = vadd.xlane.f32.xlu1 %v1654_v11 }
 0x368   :  { %v1631_v28 = vsub.f32 %v1508_v57, %v1617_v12 }
 0x369   :  { %v3436_v13 = vpop.eup %2852 }
 0x36a   :  { %v1643_v14 = vmul.f32 1.442695, %v1631_v28  ;;  %v1651_v15 = vsel %vm1254_vm1, %v3436_v13, 0.0 }
 0x36b   :  { %v1620_v16 = vpop.xlane.xlu1 %1619  ;;  %1652 = vadd.xlane.f32.xlu1 %v1651_v15 }
 0x36c   :  { %2858 = vpow2.f32 %v1643_v14  ;;  %v1632_v17 = vsub.f32 %v1513_v58, %v1620_v16 }
 0x36d   :  { %v3440_v18 = vpop.eup %2854 }
 0x36e   :  { %v1645_v19 = vmul.f32 1.442695, %v1632_v17  ;;  %v1660_v20 = vsel %vm1254_vm1, %v3440_v18, 0.0  ;;  %v3444_v21 = vpop.eup %2856 }
 0x36f   :  { %v1623_v22 = vpop.xlane.xlu0 %1622  ;;  %v957_v23 = vpop.permute.xlu1 %956  ;;  %1661 = vadd.xlane.f32.xlu0 %v1660_v20  ;;  %v1657_v34 = vsel %vm1254_vm1, %v3444_v21, 0.0 }
 0x370   :  { %2860 = vpow2.f32 %v1645_v19  ;;  %v1633_v24 = vsub.f32 %v1595_v2, %v1623_v22 }
 0x372   :  { %v1647_v27 = vmul.f32 1.442695, %v1633_v24 }
 0x373   :  { %v1626_v35 = vpop.xlane.xlu0 %1625  ;;  %v963_v36 = vpop.permute.xlu1 %962  ;;  %1658 = vadd.xlane.f32.xlu0 %v1657_v34 }
 0x374   :  { %2862 = vpow2.f32 %v1647_v27  ;;  %v1634_v37 = vsub.f32 %v1600_v3, %v1626_v35  ;;  %v974_v43 = vcombine.low %v3410_v26, %v963_v36  ;;  %v975_v44 = vcombine.high %v3410_v26, %v963_v36 }
 0x376   :  { %v3448_v38 = vpop.eup %2858  ;;  %v1649_v39 = vmul.f32 1.442695, %v1634_v37  ;;  %v982_v60 = vrot.slane %v974_v43, %v3256_v52  ;;  %v989_v26 = vrot.slane %v975_v44, %v3256_v52 }
 0x377   :  { %v959_v40 = vpop.permute.xlu0 %958  ;;  %v965_v41 = vpop.permute.xlu1 %964  ;;  %v1663_v42 = vsel %vm1254_vm1, %v3448_v38, 0.0 }
 0x378   :  { %1664 = vadd.xlane.f32.xlu0 %v1663_v42  ;;  %2864 = vpow2.f32 %v1649_v39  ;;  %v1042_v46 = vcombine.low %v3408_v25, %v965_v41  ;;  %v1043_v47 = vcombine.high %v3408_v25, %v965_v41 }
 0x37a   :  { %v3454_v45 = vpop.eup %2860  ;;  %v1050_v1 = vrot.slane %v1042_v46, %v3256_v52  ;;  %v1057_v2 = vrot.slane %v1043_v47, %v3256_v52 }
 0x37b   :  { %v969_v48 = vpop.permute.xlu0 %968  ;;  %v971_v49 = vpop.permute.xlu1 %970  ;;  %v1666_v50 = vsel %vm1254_vm1, %v3454_v45, 0.0 }
 0x37c   :  { %v990_v51 = vcombine.low %v957_v23, %v969_v48  ;;  %v991_v56 = vcombine.high %v957_v23, %v969_v48  ;;  %v1058_v57 = vcombine.low %v959_v40, %v971_v49  ;;  %v1059_v58 = vcombine.high %v959_v40, %v971_v49  ;;  %1667 = vadd.xlane.f32.xlu0 %v1666_v50 }
 0x37e   :  { %v3462_v61 = vpop.eup %2862  ;;  %v998_v62 = vrot.slane %v990_v51, %v3256_v52  ;;  %v1005_v25 = vrot.slane %v991_v56, %v3256_v52  ;;  %v1066_v63 = vrot.slane %v1058_v57, %v3256_v52  ;;  %v1073_v0 = vrot.slane %v1059_v58, %v3256_v52 }
 0x37f   :  { %v1669_v3 = vsel %vm1254_vm1, %v3462_v61, 0.0 }
 0x380   :  { %v1006_v4 = vcombine.low %v982_v60, %v998_v62  ;;  %v1007_v5 = vcombine.high %v982_v60, %v998_v62  ;;  %v1022_v6 = vcombine.low %v989_v26, %v1005_v25  ;;  %v1023_v7 = vcombine.high %v989_v26, %v1005_v25  ;;  %1670 = vadd.xlane.f32.xlu1 %v1669_v3 }
 0x381   :  { %v1074_v53 = vcombine.low %v1050_v1, %v1066_v63  ;;  %v1075_v54 = vcombine.high %v1050_v1, %v1066_v63  ;;  %v1090_v29 = vcombine.low %v1057_v2, %v1073_v0  ;;  %v1091_v55 = vcombine.high %v1057_v2, %v1073_v0 }
 0x382   :  { %v1014_v8 = vrot.slane %v1006_v4, %v3258_v59  ;;  %v1021_v9 = vrot.slane %v1007_v5, %v3258_v59  ;;  %v1030_v30 = vrot.slane %v1022_v6, %v3258_v59  ;;  %v1037_v31 = vrot.slane %v1023_v7, %v3258_v59  ;;  %v3480_v17 = vpop.eup %2864 }
 0x383   :  { %v1082_v32 = vrot.slane %v1074_v53, %v3258_v59  ;;  %v1089_v33 = vrot.slane %v1075_v54, %v3258_v59  ;;  %v1098_v11 = vrot.slane %v1090_v29, %v3258_v59  ;;  %v1105_v12 = vrot.slane %v1091_v55, %v3258_v59 }
 0x384   :  { %v1110_v28 = vcombine.low %v1014_v8, %v1021_v9  ;;  %v2489_v14 = vcombine.high %v1014_v8, %v1021_v9  ;;  %v1126_v15 = vcombine.low %v1030_v30, %v1037_v31  ;;  %v2490_v16 = vcombine.high %v1030_v30, %v1037_v31 }
 0x385   :  { %v1178_v19 = vcombine.low %v1082_v32, %v1089_v33  ;;  %v2491_v20 = vcombine.high %v1082_v32, %v1089_v33  ;;  %v1194_v22 = vcombine.low %v1098_v11, %v1105_v12  ;;  %v2492_v23 = vcombine.high %v1098_v11, %v1105_v12 }
 0x386   :  { %v1117_v24 = vrot.slane %v1110_v28, %v3256_v52  ;;  %v1125_v27 = vrot.slane %v2489_v14, %v3256_v52  ;;  %v1133_v34 = vrot.slane %v1126_v15, %v3256_v52  ;;  %v1141_v35 = vrot.slane %v2490_v16, %v3256_v52 }
 0x387   :  { %v1185_v36 = vrot.slane %v1178_v19, %v3256_v52  ;;  %v1193_v37 = vrot.slane %v2491_v20, %v3256_v52  ;;  %v1201_v39 = vrot.slane %v1194_v22, %v3256_v52  ;;  %v1209_v40 = vrot.slane %v2492_v23, %v3256_v52 }
 0x388   :  { %v1672_v41 = vsel %vm1254_vm1, %v3480_v17, 0.0  ;;  %v1142_v42 = vcombine.low %v1117_v24, %v1125_v27  ;;  %v1158_v43 = vcombine.low %v1133_v34, %v1141_v35  ;;  %v1143_v44 = vcombine.high %v1117_v24, %v1125_v27 }
 0x389   :  { %1673 = vadd.xlane.f32.xlu0 %v1672_v41  ;;  %v1210_v46 = vcombine.low %v1185_v36, %v1193_v37  ;;  %v1226_v47 = vcombine.low %v1201_v39, %v1209_v40  ;;  %v1159_v48 = vcombine.high %v1133_v34, %v1141_v35  ;;  %v1211_v49 = vcombine.high %v1185_v36, %v1193_v37 }
 0x38a   :  { %v1150_v50 = vrot.slane %v1142_v42, %v3258_v59  ;;  %v1166_v51 = vrot.slane %v1158_v43, %v3258_v59  ;;  %v1157_v56 = vrot.slane %v1143_v44, %v3258_v59  ;;  %v1227_v57 = vcombine.high %v1201_v39, %v1209_v40 }
 0x38b   :  { %v1218_v58 = vrot.slane %v1210_v46, %v3258_v59  ;;  %v1234_v60 = vrot.slane %v1226_v47, %v3258_v59  ;;  %v1173_v26 = vrot.slane %v1159_v48, %v3258_v59  ;;  %v1225_v62 = vrot.slane %v1211_v49, %v3258_v59 }
 0x38c   :  { %v1174_v25 = vcombine.low %v1150_v50, %v1166_v51  ;;  %v1175_v63 = vcombine.high %v1150_v50, %v1166_v51  ;;  %v1241_v0 = vrot.slane %v1227_v57, %v3258_v59 }
 0x38d   :  { %v1242_v1 = vcombine.low %v1218_v58, %v1234_v60  ;;  %v1243_v2 = vcombine.high %v1218_v58, %v1234_v60  ;;  %v1176_v3 = vcombine.low %v1157_v56, %v1173_v26  ;;  %v1177_v4 = vcombine.high %v1157_v56, %v1173_v26 }
 0x38e   :  { %v1244_v5 = vcombine.low %v1225_v62, %v1241_v0  ;;  %v1245_v6 = vcombine.high %v1225_v62, %v1241_v0 }
 0x38f   :  { %v2801_v7 = vpack.c.bf16 %v1242_v1, %v1174_v25  ;;  %v2805_v53 = vpack.c.bf16 %v1243_v2, %v1175_v63 }
 0x390   :  { %v2809_v54 = vpack.c.bf16 %v1244_v5, %v1176_v3  ;;  %v2813_v29 = vpack.c.bf16 %v1245_v6, %v1177_v4 }
 0x391   :  { %2802 = vmatprep.subr.bf16.mxu0 %v2801_v7  ;;  %2806 = vmatprep.subr.bf16.mxu1 %v2805_v53 }
 0x392   :  { %2804 = vmatpush3.bf16.msra.mxu0 %v2801_v7  ;;  %2808 = vmatpush3.bf16.msra.mxu1 %v2805_v53 }
 0x393   :  { %2810 = vmatprep.subr.bf16.mxu0 %v2809_v54  ;;  %2814 = vmatprep.subr.bf16.mxu1 %v2813_v29 }
 0x3f4   :  { %v1656_v55 = vpop.xlane.xlu1 %1655 }
 0x3f5   :  { %2866 = vrcp.f32 %v1656_v55 }
 0x3f8   :  { %v1653_v8 = vpop.xlane.xlu1 %1652 }
 0x3f9   :  { %2868 = vrcp.f32 %v1653_v8 }
 0x3fc   :  { %v1662_v9 = vpop.xlane.xlu0 %1661 }
 0x3fd   :  { %2870 = vrcp.f32 %v1662_v9 }
 0x3ff   :  { %v2867_v31 = vpop.eup %2866 }
 0x400   :  { %v1659_v30 = vpop.xlane.xlu0 %1658  ;;  %v1678_v11 = vmul.f32 %v2867_v31, %v3432_v10 }
 0x401   :  { %2872 = vrcp.f32 %v1659_v30 }
 0x403   :  { %v2869_v32 = vpop.eup %2868 }
 0x404   :  { %v1676_v33 = vmul.f32 %v2869_v32, %v3436_v13 }
 0x405   :  { %v1665_v12 = vpop.xlane.xlu0 %1664 }
 0x406   :  { %2874 = vrcp.f32 %v1665_v12  ;;  %2686 = vmatprep.mubr.msk.f32.mxu0 %vm1254_vm1, %v1676_v33 }
 0x407   :  { %2687 = vmatmul.mubr.msk.f32.vlgmr.msra.gmra.mrb[4].mxu0 %vm1254_vm1, %v1678_v11  ;;  %v2871_v14 = vpop.eup %2870 }
 0x408   :  { %2812 = vmatpush3.bf16.msra.mxu0 %v2809_v54  ;;  %v1682_v19 = vmul.f32 %v2871_v14, %v3440_v18 }
 0x409   :  { %v1668_v28 = vpop.xlane.xlu0 %1667 }
 0x40a   :  { %2876 = vrcp.f32 %v1668_v28 }
 0x40b   :  { %v2873_v15 = vpop.eup %2872 }
 0x40c   :  { %v1680_v16 = vmul.f32 %v2873_v15, %v3444_v21 }
 0x40d   :  { %v1671_v20 = vpop.xlane.xlu1 %1670 }
 0x40e   :  { %2878 = vrcp.f32 %v1671_v20  ;;  %2693 = vmatprep.mubr.msk.f32.mxu1 %vm1254_vm1, %v1680_v16 }
 0x40f   :  { %2694 = vmatmul.mubr.msk.f32.vlgmr.msra.gmra.mrb[10].mxu1 %vm1254_vm1, %v1682_v19 }
 0x410   :  { %v2875_v10 = vpop.eup %2874  ;;  %2816 = vmatpush3.bf16.msra.mxu1 %v2813_v29 }
 0x411   :  { %v1684_v13 = vmul.f32 %v2875_v10, %v3448_v38 }
 0x413   :  { %2700 = vmatprep.mubr.msk.f32.mxu0 %vm1254_vm1, %v1684_v13 }
 0x414   :  { %v2877_v22 = vpop.eup %2876 }
 0x415   :  { %v1686_v23 = vmul.f32 %v2877_v22, %v3454_v45 }
 0x416   :  { %v1674_v24 = vpop.xlane.xlu0 %1673 }
 0x417   :  { %2880 = vrcp.f32 %v1674_v24  ;;  %2701 = vmatmul.mubr.msk.f32.vlgmr.msra.gmra.mrb[6].mxu0 %vm1254_vm1, %v1686_v23 }
 0x418   :  { %v2879_v18 = vpop.eup %2878 }
 0x419   :  { %v1688_v21 = vmul.f32 %v2879_v18, %v3462_v61 }
 0x41b   :  { %2707 = vmatprep.mubr.msk.f32.mxu1 %vm1254_vm1, %v1688_v21 }
 0x421   :  { %v2881_v27 = vpop.eup %2880 }
 0x422   :  { %v1690_v34 = vmul.f32 %v2881_v27, %v3480_v17 }
 0x424   :  { %2708 = vmatmul.mubr.msk.f32.vlgmr.msra.gmra.mrb[12].mxu1 %vm1254_vm1, %v1690_v34 }
 0x4da   :  { %v2688_v38 = vpop.f32.mrb[4].mxu0 }
 0x4db   :  { %v1763_v35 = vpop.f32.mrb[5].mxu0 }
 0x4e2   :  { %v2695_v36 = vpop.f32.mrb[10].mxu1 }
 0x4e3   :  { %v1844_v37 = vpop.f32.mrb[11].mxu1 }
 0x4ea   :  { %v2702_v39 = vpop.f32.mrb[6].mxu0 }
 0x4eb   :  { %v2083_v45 = vcombine.low %v2688_v38, %v2702_v39  ;;  %v2084_v40 = vcombine.high %v2688_v38, %v2702_v39  ;;  %v1925_v41 = vpop.f32.mrb[7].mxu0 }
 0x4ec   :  { %v2015_v42 = vcombine.low %v1763_v35, %v1925_v41  ;;  %v2016_v43 = vcombine.high %v1763_v35, %v1925_v41 }
 0x4ed   :  { %v2091_v17 = vrot.slane %v2083_v45, %v3256_v52  ;;  %v2098_v50 = vrot.slane %v2084_v40, %v3256_v52 }
 0x4ee   :  { %v2023_v57 = vrot.slane %v2015_v42, %v3256_v52  ;;  %v2030_v58 = vrot.slane %v2016_v43, %v3256_v52 }
 0x4f7   :  { %v2709_v44 = vpop.f32.mrb[12].mxu1 }
 0x4f8   :  { %v2099_v46 = vcombine.low %v2695_v36, %v2709_v44  ;;  %v2100_v61 = vcombine.high %v2695_v36, %v2709_v44  ;;  %v2006_v47 = vpop.f32.mrb[13].mxu1 }
 0x4f9   :  { %v2031_v48 = vcombine.low %v1844_v37, %v2006_v47  ;;  %v2032_v49 = vcombine.high %v1844_v37, %v2006_v47 }
 0x4fa   :  { %v2107_v51 = vrot.slane %v2099_v46, %v3256_v52  ;;  %v2114_v56 = vrot.slane %v2100_v61, %v3256_v52 }
 0x4fb   :  { %v2039_v60 = vrot.slane %v2031_v48, %v3256_v52  ;;  %v2046_v26 = vrot.slane %v2032_v49, %v3256_v52 }
 0x4fc   :  { %v2115_v62 = vcombine.low %v2091_v17, %v2107_v51  ;;  %v2116_v25 = vcombine.high %v2091_v17, %v2107_v51  ;;  %v2131_v63 = vcombine.low %v2098_v50, %v2114_v56  ;;  %v2132_v0 = vcombine.high %v2098_v50, %v2114_v56 }
 0x4fd   :  { %v2047_v1 = vcombine.low %v2023_v57, %v2039_v60  ;;  %v2048_v2 = vcombine.high %v2023_v57, %v2039_v60  ;;  %v2063_v3 = vcombine.low %v2030_v58, %v2046_v26  ;;  %v2064_v4 = vcombine.high %v2030_v58, %v2046_v26 }
 0x4fe   :  { %v2123_v5 = vrot.slane %v2115_v62, %v3258_v59  ;;  %v2130_v6 = vrot.slane %v2116_v25, %v3258_v59  ;;  %v2139_v7 = vrot.slane %v2131_v63, %v3258_v59  ;;  %v2146_v53 = vrot.slane %v2132_v0, %v3258_v59 }
 0x4ff   :  { %v2055_v54 = vrot.slane %v2047_v1, %v3258_v59  ;;  %v2062_v29 = vrot.slane %v2048_v2, %v3258_v59  ;;  %v2071_v55 = vrot.slane %v2063_v3, %v3258_v59  ;;  %v2078_v8 = vrot.slane %v2064_v4, %v3258_v59 }
 0x500   :  { %v2219_v9 = vcombine.low %v2123_v5, %v2130_v6  ;;  %v2519_v30 = vcombine.high %v2123_v5, %v2130_v6  ;;  %v2235_v31 = vcombine.low %v2139_v7, %v2146_v53  ;;  %v2520_v32 = vcombine.high %v2139_v7, %v2146_v53 }
 0x501   :  { %v2151_v33 = vcombine.low %v2055_v54, %v2062_v29  ;;  %v2517_v11 = vcombine.high %v2055_v54, %v2062_v29  ;;  %v2167_v12 = vcombine.low %v2071_v55, %v2078_v8  ;;  %v2518_v28 = vcombine.high %v2071_v55, %v2078_v8 }
 0x502   :  { %v2226_v14 = vrot.slane %v2219_v9, %v3256_v52  ;;  %v2234_v15 = vrot.slane %v2519_v30, %v3256_v52  ;;  %v2242_v16 = vrot.slane %v2235_v31, %v3256_v52  ;;  %v2250_v19 = vrot.slane %v2520_v32, %v3256_v52  ;;  %v2364_v9 = vld [vmem:[#allocation10] sm:$0xff]  ;;  %v2365_v30 = vld [vmem:[#allocation10 + $0x8] sm:$0xff]  ;;  %v2366_v32 = vld [vmem:[#allocation10 + $0x10] sm:$0xff] }
 0x503   :  { %v2158_v20 = vrot.slane %v2151_v33, %v3256_v52  ;;  %v2166_v10 = vrot.slane %v2517_v11, %v3256_v52  ;;  %v2174_v13 = vrot.slane %v2167_v12, %v3256_v52  ;;  %v2182_v22 = vrot.slane %v2518_v28, %v3256_v52  ;;  %v2367_v33 = vld [vmem:[#allocation10 + $0x18] sm:$0xff]  ;;  %v2368_v12 = vld [vmem:[#allocation10 + $0x20] sm:$0xff]  ;;  %v2369_v28 = vld [vmem:[#allocation10 + $0x28] sm:$0xff] }
 0x504   :  { %v2252_v23 = vcombine.high %v2226_v14, %v2234_v15  ;;  %v2268_v24 = vcombine.high %v2242_v16, %v2250_v19  ;;  %v2251_v18 = vcombine.low %v2226_v14, %v2234_v15  ;;  %v2267_v21 = vcombine.low %v2242_v16, %v2250_v19  ;;  %v2370_v15 = vld [vmem:[#allocation10 + $0x30] sm:$0xff]  ;;  %v2371_v16 = vld [vmem:[#allocation10 + $0x38] sm:$0xff] }
 0x505   :  { %v2184_v27 = vcombine.high %v2158_v20, %v2166_v10  ;;  %v2200_v34 = vcombine.high %v2174_v13, %v2182_v22  ;;  %v2183_v38 = vcombine.low %v2158_v20, %v2166_v10  ;;  %v2199_v35 = vcombine.low %v2174_v13, %v2182_v22 }
 0x506   :  { %v2266_v36 = vrot.slane %v2252_v23, %v3258_v59  ;;  %v2282_v37 = vrot.slane %v2268_v24, %v3258_v59  ;;  %v2259_v39 = vrot.slane %v2251_v18, %v3258_v59  ;;  %v2275_v45 = vrot.slane %v2267_v21, %v3258_v59  ;;  %v2521_v21 = vld [vmem:[%s3584_s5] ss:$0 sm:$0xff]  ;;  %s3018_s5 = scalar_lea.vmem %s2461_s3, 256 }
 0x507   :  { %v2198_v40 = vrot.slane %v2184_v27, %v3258_v59  ;;  %v2214_v52 = vrot.slane %v2200_v34, %v3258_v59  ;;  %v2191_v41 = vrot.slane %v2183_v38, %v3258_v59  ;;  %v2207_v42 = vrot.slane %v2199_v35, %v3258_v59  ;;  %v2522_v34 = vld [vmem:[%s3585_s6] ss:$0 sm:$0xff]  ;;  %p3019_p6 = scmp.ne.s32.totalorder %s2461_s3, %s3018_s5  ;;  %p3024_p8 = scmp.lt.s32.totalorder %s3018_s5, %s3018_s5 }
 0x508   :  { %v2285_v43 = vcombine.low %v2266_v36, %v2282_v37  ;;  %v2284_v44 = vcombine.high %v2259_v39, %v2275_v45  ;;  %v2286_v46 = vcombine.high %v2266_v36, %v2282_v37  ;;  %v2283_v61 = vcombine.low %v2259_v39, %v2275_v45 }
 0x509   :  { %v2218_v47 = vcombine.high %v2198_v40, %v2214_v52  ;;  %v2216_v48 = vcombine.high %v2191_v41, %v2207_v42  ;;  %v2217_v49 = vcombine.low %v2198_v40, %v2214_v52  ;;  %v2215_v17 = vcombine.low %v2191_v41, %v2207_v42  ;;  %p3025_p9 = por %p3024_p8, %p3023_p7 }
 0x50a   :  { %2299 = vrot.lane.b32.xlu1 %v2285_v43, %s3063_s11  ;;  %2291 = vrot.lane.b32.xlu0 %v2284_v44, %s3064_s13  ;;  %v2817_v31 = vpack.c.bf16 %v2365_v30, %v2364_v9  ;;  %v2821_v11 = vpack.c.bf16 %v2367_v33, %v2366_v32  ;;  %v2825_v14 = vpack.c.bf16 %v2369_v28, %v2368_v12 }
 0x50b   :  { %v2829_v19 = vpack.c.bf16 %v2371_v16, %v2370_v15  ;;  %p3026_p10 = pnand %p3025_p9, %p3019_p6 }
 0x50c   :  { %2818 = vmatprep.subr.bf16.mxu0 %v2817_v31 }
 0x50d   :  { %2820 = vmatpush3.bf16.msra.mxu0 %v2817_v31 }
 0x50e   :  { %2305 = vrot.lane.b32.xlu0 %v2218_v47, %s3065_s14  ;;  %2289 = vrot.lane.b32.xlu1 %v2216_v48, %s3064_s13 }
 0x50f   :  { %2822 = vmatprep.subr.bf16.mxu0 %v2821_v11 }
 0x511   :  { %2824 = vmatpush3.bf16.msra.mxu0 %v2821_v11 }
 0x512   :  { %2297 = vrot.lane.b32.xlu1 %v2217_v49, %s3063_s11  ;;  %2826 = vmatprep.subr.bf16.mxu0 %v2825_v14 }
 0x515   :  { %2828 = vmatpush3.bf16.msra.mxu0 %v2825_v14 }
 0x516   :  { %2307 = vrot.lane.b32.xlu1 %v2286_v46, %s3065_s14  ;;  %2830 = vmatprep.subr.bf16.mxu0 %v2829_v19 }
 0x519   :  { %2832 = vmatpush3.bf16.msra.mxu0 %v2829_v19 }
 0x57c   :  { %v2300_v50 = vpop.permute.xlu1 %2299  ;;  %v2292_v51 = vpop.permute.xlu0 %2291 }
 0x57d   :  { %v2312_v58 = vsel %vm1254_vm1, %v2283_v61, %v2292_v51 }
 0x57e   :  { %v2315_v0 = vsel %vm2313_vm4, %v2312_v58, %v2300_v50 }
 0x580   :  { %v2290_v59 = vpop.permute.xlu1 %2289  ;;  %v2306_v60 = vpop.permute.xlu0 %2305 }
 0x581   :  { %v2311_v56 = vsel %vm1254_vm1, %v2215_v17, %v2290_v59 }
 0x584   :  { %v2298_v57 = vpop.permute.xlu1 %2297 }
 0x585   :  { %v2314_v26 = vsel %vm2313_vm4, %v2311_v56, %v2298_v57 }
 0x586   :  { %v2317_v62 = vsel %vm2316_vm3, %v2314_v26, %v2306_v60 }
 0x587   :  { %v2319_v25 = vsel %vm122_vm0, %v2317_v62, 0.0 }
 0x588   :  { %v2308_v63 = vpop.permute.xlu1 %2307  ;;  %2320 = vadd.xlane.f32.xlu0 %v2319_v25 }
 0x589   :  { %v2318_v1 = vsel %vm2316_vm3, %v2315_v0, %v2308_v63 }
 0x58a   :  { %v2322_v2 = vsel %vm122_vm0, %v2318_v1, 0.0 }
 0x58b   :  { %2323 = vadd.xlane.f32.xlu1 %v2322_v2 }
 0x615   :  { %v2321_v3 = vpop.xlane.xlu0 %2320 }
 0x616   :  { %v2326_v4 = vmul.f32 0.015625, %v2321_v3 }
 0x618   :  { %v2328_v5 = vsub.f32 %v2317_v62, %v2326_v4  ;;  %v2324_v6 = vpop.xlane.xlu1 %2323 }
 0x619   :  { %v2327_v7 = vmul.f32 0.015625, %v2324_v6 }
 0x61a   :  { %v2330_v53 = vmul.f32 %v2328_v5, %v2328_v5 }
 0x61b   :  { %v2329_v54 = vsub.f32 %v2318_v1, %v2327_v7 }
 0x61c   :  { %v2332_v29 = vsel %vm122_vm0, %v2330_v53, 0.0 }
 0x61d   :  { %2333 = vadd.xlane.f32.xlu0 %v2332_v29  ;;  %v2331_v55 = vmul.f32 %v2329_v54, %v2329_v54 }
 0x61f   :  { %v2335_v8 = vsel %vm122_vm0, %v2331_v55, 0.0 }
 0x621   :  { %2336 = vadd.xlane.f32.xlu0 %v2335_v8 }
 0x6aa   :  { %v2334_v20 = vpop.xlane.xlu0 %2333 }
 0x6ab   :  { %v2338_v10 = vmul.f32 0.015625, %v2334_v20 }
 0x6ad   :  { %v2340_v13 = vadd.f32 1e-05, %v2338_v10 }
 0x6ae   :  { %v2337_v22 = vpop.xlane.xlu0 %2336 }
 0x6af   :  { %2882 = vrsqrt.f32 %v2340_v13  ;;  %v2339_v23 = vmul.f32 0.015625, %v2337_v22 }
 0x6b1   :  { %v2341_v24 = vadd.f32 1e-05, %v2339_v23 }
 0x6b3   :  { %2884 = vrsqrt.f32 %v2341_v24 }
 0x6b9   :  { %v2883_v18 = vpop.eup %2882 }
 0x6ba   :  { %v2344_v27 = vmul.f32 %v2883_v18, %v2328_v5 }
 0x6bc   :  { %v2353_v38 = vmul.f32 %v2521_v21, %v2344_v27 }
 0x6bd   :  { %v2885_v35 = vpop.eup %2884 }
 0x6be   :  { %v2345_v36 = vmul.f32 %v2885_v35, %v2329_v54  ;;  %v2362_v37 = vadd.f32 %v2522_v34, %v2353_v38 }
 0x6c0   :  { %v2354_v39 = vmul.f32 %v2521_v21, %v2345_v36  ;;  %2726 = vmatprep.mubr.msk.f32.mxu0 %vm122_vm0, %v2362_v37 }
 0x6c2   :  { %v2363_v45 = vadd.f32 %v2522_v34, %v2354_v39 }
 0x6c4   :  { %2727 = vmatmul.mubr.msk.f32.vlgmr.msra.gmra.mrb[8].mxu0 %vm122_vm0, %v2363_v45 }
 0x797   :  { %v2728_v40 = vpop.f32.mrb[8].mxu0 }
 0x798   :  { %2454 = vst.msk [vmem:[#allocation13 + $0x8] sm:$0xff] %vm122_vm0, %v2728_v40  ;;  %v2444_v52 = vpop.f32.mrb[9].mxu0 }
 0x799   :  { %2453 = vst.msk [vmem:[#allocation13] sm:$0xff] %vm122_vm0, %v2444_v52 }
 0x79a   :  { %3029 = shalt.err (!%p3026_p10)
}
 0x79b   :  { %s3030_s2 = scalar_lea.hbm %s3587_s8, 256 }
 0x79c   :  { %p3031_p11 = scmp.ne.s32.totalorder %s3587_s8, %s3030_s2  ;;  %p3034_p12 = scmp.lt.u32.totalorder %s3030_s2, %s3587_s8 }
 0x79e   :  { %p3036_p13 = pnand %p3034_p12, %p3031_p11 }
 0x7a0   :  { %3039 = shalt.err (!%p3036_p13)
}
 0x7a1   :  { %2466 = dma.vmem_to_hbm [thread:$0]  %s2461_s3, 256, %s3587_s8, [#allocation4], %s3052_s17, %s3052_s17, %s3053_s18  }
 0x7a2   :  { %3048 = dma.done.wait [#allocation4], 256  }
 0x7a3   :  { %3049 = vsyncadd [#allocation4], 4294967040 }
 0x7a4   :  { %2470 = vsyncpa [#allocation3], 1 }
 0x7a5   :  { %2471 = vsyncpa [#allocation6], 1 }
 0x7a6   :  { %2472 = vsyncpa [#allocation9], 1 }
 0x7a7   :  { %2473 = vsyncpa [#allocation12], 1 }
 0x7a8   :  { %2474 = vsyncpa [#allocation4], 1 }

</bundles_post_ra>
